<compile_context>
chip_gen: v6e
topology: v6e:2x2x1
jax: 0.10.0
libtpu: 0.0.40
codegen_flags: <defaults>
</compile_context>

<pallas_src>
import functools

import jax
import jax.numpy as jnp
from jax import lax
from jax.experimental import pallas as pl
from jax.experimental.pallas import tpu as pltpu


def _round_up(v, m):
    return ((v + m - 1) // m) * m


def _pick_tile(dim, cap, unit=128):
    """Tile size for one matmul axis (always a multiple of 128).

    Uses the full 128-rounded extent if it fits under `cap`; otherwise prefers the
    largest 128-multiple <= cap that evenly divides the 128-rounded extent (uniform
    blocks, no ragged tail) as long as it is >= cap/2; else falls back to cap and
    lets the tail block be handled by in-kernel masking / masked writeback."""
    padded = _round_up(dim, unit)
    cap_floor = max(unit, (cap // unit) * unit)
    if padded <= cap_floor:
        return padded
    t = cap_floor
    while t >= max(unit, cap_floor // 2):
        if padded % t == 0:
            return t
        t -= unit
    return cap_floor


# ----------------------------- single-block kernels -------------------------------


def _fc_single_kernel(x_ref, w_ref, o_ref):
    o_ref[...] = jnp.dot(
        x_ref[...], w_ref[...], preferred_element_type=jnp.float32
    ).astype(o_ref.dtype)


def _fc_single_kernel_bias(x_ref, w_ref, b_ref, o_ref):
    acc = jnp.dot(x_ref[...], w_ref[...], preferred_element_type=jnp.float32)
    acc = acc + b_ref[...].astype(jnp.float32)
    o_ref[...] = acc.astype(o_ref.dtype)


# --------------------------------- tiled kernel ------------------------------------


def _fc_tiled_kernel(*refs, use_bias, acc_in_out, tk, k_rem):
    # Ref order: x, w, [bias], out, [acc scratch]
    if use_bias:
        x_ref, w_ref, b_ref = refs[0], refs[1], refs[2]
        rest = refs[3:]
    else:
        x_ref, w_ref = refs[0], refs[1]
        b_ref = None
        rest = refs[2:]
    o_ref = rest[0]
    # f32 output: the resident output block IS the accumulator (no scratch/epilogue).
    acc_ref = o_ref if acc_in_out else rest[1]

    k = pl.program_id(2)
    last_k = pl.num_programs(2) - 1

    @pl.when(k == 0)
    def _():
        if use_bias:
            # Fold bias (kept in f32) into the accumulator init.
            acc_ref[...] = jnp.broadcast_to(
                b_ref[...].astype(jnp.float32), acc_ref.shape
            )
        else:
            acc_ref[...] = jnp.zeros_like(acc_ref)

    x = x_ref[...]
    w = w_ref[...]
    if k_rem:
        # K is not a multiple of tk: the last K block extends past the real K.
        # Zero BOTH operands in the tail region (stale VMEM could be NaN; 0*0 == 0),
        # so the garbage never contributes to valid outputs. Emitted only when a
        # tail actually exists (k_rem is a compile-time constant).
        valid = jnp.where(k == last_k, k_rem, tk)
        x = jnp.where(
            lax.broadcasted_iota(jnp.int32, x.shape, 1) < valid, x, jnp.zeros_like(x)
        )
        w = jnp.where(
            lax.broadcasted_iota(jnp.int32, w.shape, 0) < valid, w, jnp.zeros_like(w)
        )

    acc_ref[...] += jnp.dot(x, w, preferred_element_type=jnp.float32)

    if not acc_in_out:

        @pl.when(k == last_k)
        def _():
            o_ref[...] = acc_ref[...].astype(o_ref.dtype)


# ---------------------------------- wrapper ----------------------------------------

_SINGLE_BLOCK_BYTES = 20 * 1024 * 1024       # gate for the no-grid fast path
_SINGLE_BLOCK_VMEM_LIMIT = 40 * 1024 * 1024  # explicit, safe on v5e/v7x
_TILED_VMEM_LIMIT = 48 * 1024 * 1024         # < v7x 64 MiB/TC physical


def fully_connect0(x, weights, bias=None, *, force_tiled=False):
    """out = x @ weights (+ bias), computed with Pallas TPU kernels."""
    M, K = x.shape
    Kw, N = weights.shape
    assert K == Kw, "in_features mismatch between x and weights"
    out_dtype = x.dtype
    use_bias = bias is not None

    x_item = jnp.dtype(x.dtype).itemsize
    w_item = jnp.dtype(weights.dtype).itemsize
    out_item = jnp.dtype(out_dtype).itemsize
    b_item = jnp.dtype(bias.dtype).itemsize if use_bias else 0

    io_bytes = (
        M * K * x_item + K * N * w_item + M * N * out_item
        + (N * b_item if use_bias else 0)
    )
    cost = pl.CostEstimate(
        flops=2 * M * K * N, transcendentals=0, bytes_accessed=io_bytes
    )

    if use_bias:
        bias2d = bias.reshape(1, N)  # keep bias dtype (f32) end-to-end

    # ---------------- single-block fast path (no grid, no K loop) ------------------
    # Whole working set incl. the f32 dot temporary must fit.
    single_bytes = io_bytes + M * N * 4
    if not force_tiled and single_bytes <= _SINGLE_BLOCK_BYTES:
        vmem = pl.BlockSpec(memory_space=pltpu.MemorySpace.VMEM)
        if use_bias:
            kernel, args, in_specs = (
                _fc_single_kernel_bias, (x, weights, bias2d), [vmem, vmem, vmem]
            )
        else:
            kernel, args, in_specs = _fc_single_kernel, (x, weights), [vmem, vmem]
        return pl.pallas_call(
            kernel,
            out_shape=jax.ShapeDtypeStruct((M, N), out_dtype),
            in_specs=in_specs,
            out_specs=pl.BlockSpec(memory_space=pltpu.MemorySpace.VMEM),
            compiler_params=pltpu.CompilerParams(
                vmem_limit_bytes=_SINGLE_BLOCK_VMEM_LIMIT
            ),
            cost_estimate=cost,
        )(*args)

    # --------------------------------- tiled path ----------------------------------
    # No wrapper-side padding: inputs stream straight from HBM. Dtype-aware sublane
    # rounding for tm (f32: 8, bf16: 16, int8/fp8: 32); tm up to 512 to cut W
    # re-reads for large batches; large K/N tiles to amortize per-grid-step overhead.
    sublane = 8 * max(1, 4 // x_item)
    tm = min(512, _round_up(M, sublane))
    tn = _pick_tile(N, 1024)
    tk = _pick_tile(K, 2048)

    grid = (pl.cdiv(M, tm), pl.cdiv(N, tn), pl.cdiv(K, tk))
    k_rem = K % tk  # != 0 -> last K block is masked inside the kernel

    acc_in_out = jnp.dtype(out_dtype) == jnp.dtype(jnp.float32)

    in_specs = [
        pl.BlockSpec((tm, tk), lambda i, j, k: (i, k)),
        pl.BlockSpec((tk, tn), lambda i, j, k: (k, j)),
    ]
    args = [x, weights]
    if use_bias:
        in_specs.append(pl.BlockSpec((1, tn), lambda i, j, k: (0, j)))
        args.append(bias2d)

    scratch_shapes = [] if acc_in_out else [pltpu.VMEM((tm, tn), jnp.float32)]

    kernel = functools.partial(
        _fc_tiled_kernel,
        use_bias=use_bias,
        acc_in_out=acc_in_out,
        tk=tk,
        k_rem=k_rem,
    )

    return pl.pallas_call(
        kernel,
        out_shape=jax.ShapeDtypeStruct((M, N), out_dtype),
        grid_spec=pltpu.PrefetchScalarGridSpec(
            num_scalar_prefetch=0,
            grid=grid,
            in_specs=in_specs,
            out_specs=pl.BlockSpec((tm, tn), lambda i, j, k: (i, j)),
            scratch_shapes=scratch_shapes,
        ),
        compiler_params=pltpu.CompilerParams(
            # TODO(synk): on v7x, evaluate pltpu.CORE_PARALLEL on the j axis if
            # "parallel" alone does not shard blocks across both TensorCores.
            dimension_semantics=("parallel", "parallel", "arbitrary"),
            vmem_limit_bytes=_TILED_VMEM_LIMIT,
        ),
        cost_estimate=cost,
    )(*args)


def init_fully_connect0_params(key, in_features, out_features, bias=False,
                               dtype=jnp.float32):
    """Matches the PyTorch module's reset_parameters():
    kaiming_normal_(W, mode='fan_out', nonlinearity='relu') on a tensor of shape
    (in_features, out_features) -> fan = in_features, gain = sqrt(2),
    std = sqrt(2 / in_features). Bias (if used) is zero-filled."""
    std = (2.0 / in_features) ** 0.5
    w = jax.random.normal(key, (in_features, out_features), dtype=dtype) * std
    b = jnp.zeros((out_features,), dtype=jnp.float32) if bias else None
    return w, b


if __name__ == "__main__":
    key = jax.random.PRNGKey(0)
    kx, kw, kx2, kw2, kb2, kx3, kw3 = jax.random.split(key, 7)

    # -------- module-consistent small shape: single-block fast path ------------------
    batch, in_features, out_features = 8, 256, 128
    x = jax.random.normal(kx, (batch, in_features), dtype=jnp.float32)
    w, b = init_fully_connect0_params(kw, in_features, out_features, bias=False)

    out = jax.block_until_ready(fully_connect0(x, w, b))
    ref = jnp.matmul(x, w, precision=jax.lax.Precision.HIGHEST)
    assert out.shape == (batch, out_features)
    assert jnp.allclose(out, ref, atol=5e-3, rtol=5e-3)

    # -------- tiled path: bias on, K and N NOT multiples of 128 (tail masking) -------
    m2, k2, n2 = 16, 2320, 200
    x2 = jax.random.normal(kx2, (m2, k2), dtype=jnp.float32)
    w2 = jax.random.normal(kw2, (k2, n2), dtype=jnp.float32) * (2.0 / k2) ** 0.5
    b2 = jax.random.normal(kb2, (n2,), dtype=jnp.float32)

    out2 = jax.block_until_ready(fully_connect0(x2, w2, b2, force_tiled=True))
    ref2 = jnp.matmul(x2, w2, precision=jax.lax.Precision.HIGHEST) + b2
    assert out2.shape == (m2, n2)
    assert jnp.allclose(out2, ref2, atol=5e-3, rtol=5e-3)

    # -------- tiled path, bf16 (scratch accumulator, dtype-aware tm rounding) --------
    m3, k3, n3 = 32, 384, 160
    x3 = jax.random.normal(kx3, (m3, k3), dtype=jnp.float32).astype(jnp.bfloat16)
    w3 = (jax.random.normal(kw3, (k3, n3), dtype=jnp.float32)
          * (2.0 / k3) ** 0.5).astype(jnp.bfloat16)

    out3 = jax.block_until_ready(fully_connect0(x3, w3, None, force_tiled=True))
    ref3 = jnp.matmul(x3.astype(jnp.float32), w3.astype(jnp.float32),
                      precision=jax.lax.Precision.HIGHEST)
    assert out3.shape == (m3, n3)
    assert jnp.allclose(out3.astype(jnp.float32), ref3, atol=3e-2, rtol=3e-2)

    print("KERNEL_OK")
</pallas_src>

<mosaic_0001>
module attributes {stable_mosaic.version = 11 : i64} {
  func.func @_fc_single_kernel(%arg0: memref<8x256xf32, #tpu.memory_space<vmem>>, %arg1: memref<256x128xf32, #tpu.memory_space<vmem>>, %arg2: memref<8x128xf32, #tpu.memory_space<vmem>>) attributes {dimension_semantics = [], scalar_prefetch = 0 : i64, scratch_operands = 0 : i64, tpu.core_type = #tpu.core_type<tc>} {
    %c0 = arith.constant 0 : index
    %c0_0 = arith.constant 0 : index
    %0 = vector.load %arg0[%c0, %c0_0] : memref<8x256xf32, #tpu.memory_space<vmem>>, vector<8x256xf32>
    %c0_1 = arith.constant 0 : index
    %c0_2 = arith.constant 0 : index
    %1 = vector.load %arg1[%c0_1, %c0_2] : memref<256x128xf32, #tpu.memory_space<vmem>>, vector<256x128xf32>
    %cst = arith.constant dense<0.000000e+00> : vector<8x128xf32>
    %2 = tpu.matmul %0, %1, %cst {dimension_numbers = #tpu.dot_dimension_numbers<[1], [0], [0], [1], [0, 0, 1, 1], [], []>} : vector<8x256xf32>, vector<256x128xf32>, vector<8x128xf32> -> vector<8x128xf32>
    %c0_3 = arith.constant 0 : index
    %c0_4 = arith.constant 0 : index
    %3 = vector.load %arg2[%c0_3, %c0_4] : memref<8x128xf32, #tpu.memory_space<vmem>>, vector<8x128xf32>
    tpu.vector_store %arg2[%c0_3, %c0_4], %2 {strides = array<i32>} : memref<8x128xf32, #tpu.memory_space<vmem>>, vector<8x128xf32>,
    return
  }
}

</mosaic_0001>

<bundles_post_ra>
// kernel: tpu_custom_call.1
= control target key start
LH: loop header
LB: loop body
LE: loop exit
PB: predicated region body
PF: predicated region fallthrough
CT: control target
= control target key end

     0   :  { %7 = vsyncpa [#allocation3], 0  ;;  %s294_s0 = inlined_call_operand.hbm [shape: f32[8,256], index: 0, kind: input, shape index: {}]   ;;  %s295_s1 = inlined_call_operand.hbm [shape: f32[256,128], index: 1, kind: input, shape index: {}]   ;;  %s296_s2 = inlined_call_operand.hbm [shape: f32[8,128], index: 2, kind: output, shape index: {}]  }
   0x1   :  { %8 = vsyncpa [#allocation6], 0 }
   0x2   :  { %9 = vsyncpa [#allocation4], 0  ;;  %s265_s9 = smov [#allocation2]   ;;  %s266_s11 = smov [#allocation5]  }
   0x3   :  { %s16_s10 = sshll.u32 %s265_s9, 4  ;;  %s25_s12 = sshll.u32 %s266_s11, 4  ;;  %s17_s10 = int_to_ptr.vmem [resolvable:$true] %s16_s10  ;;  %s26_s12 = int_to_ptr.vmem [resolvable:$true] %s25_s12 }
   0x4   :  { %s207_s13 = scalar_lea.vmem %s17_s10, 256  ;;  %p212_p1 = scmp.lt.s32.totalorder %s17_s10, %s17_s10 }
   0x5   :  { %p208_p0 = scmp.ne.s32.totalorder %s17_s10, %s207_s13  ;;  %p213_p2 = scmp.lt.s32.totalorder %s207_s13, %s207_s13 }
   0x7   :  { %p214_p3 = por %p213_p2, %p212_p1 }
   0x9   :  { %p215_p4 = pnand %p214_p3, %p208_p0 }
   0xb   :  { %218 = shalt.err (!%p215_p4)
}
   0xc   :  { %19 = dma.hbm_to_vmem [thread:$0]  %s294_s0, 256, %s17_s10, [#allocation3]  }
   0xd   :  { %s227_s16 = scalar_lea.vmem %s26_s12, 4096  ;;  %p232_p6 = scmp.lt.s32.totalorder %s26_s12, %s26_s12 }
   0xe   :  { %p228_p5 = scmp.ne.s32.totalorder %s26_s12, %s227_s16  ;;  %p233_p7 = scmp.lt.s32.totalorder %s227_s16, %s227_s16 }
  0x10   :  { %p234_p8 = por %p233_p7, %p232_p6 }
  0x12   :  { %p235_p9 = pnand %p234_p8, %p228_p5 }
  0x14   :  { %238 = shalt.err (!%p235_p9)
}
  0x15   :  { %s267_s17 = smov 128   ;;  %s268_s18 = smov 8  }
  0x16   :  { %31 = dma.hbm_to_vmem [thread:$0]  %s295_s1, 4096, %s26_s12, [#allocation6], %s267_s17, %s267_s17, %s268_s18  }
  0x17   :  { %259 = dma.done.wait [#allocation3], 256  }
  0x18   :  { %260 = vsyncadd [#allocation3], 4294967040 }
  0x19   :  { %261 = dma.done.wait [#allocation6], 4096  }
  0x1a   :  { %262 = vsyncadd [#allocation6], 4294963200  ;;  %v71_v0 = vld [vmem:[#allocation5 + $0xf8] sm:$0xff]  ;;  %v70_v2 = vld [vmem:[#allocation5 + $0xf0] sm:$0xff]  ;;  %s269_s0 = smov [#allocation7]  }
  0x1b   :  { %v55_v1 = vld [vmem:[#allocation5 + $0x78] sm:$0xff]  ;;  %159 = vmatprep.subr.mxu0 %v71_v0  ;;  %v54_v3 = vld [vmem:[#allocation5 + $0x70] sm:$0xff]  ;;  %v69_v4 = vld [vmem:[#allocation5 + $0xe8] sm:$0xff]  ;;  %s149_s1 = sshll.u32 %s269_s0, 4  ;;  %s150_s1 = int_to_ptr.vmem [resolvable:$true] %s149_s1 }
  0x1c   :  { %160 = vmatpush3.msra.mxu0 %v55_v1  ;;  %v53_v5 = vld [vmem:[#allocation5 + $0x68] sm:$0xff]  ;;  %v68_v6 = vld [vmem:[#allocation5 + $0xe0] sm:$0xff]  ;;  %v67_v8 = vld [vmem:[#allocation5 + $0xd8] sm:$0xff]  ;;  %s239_s21 = scalar_lea.vmem %s150_s1, 128  ;;  %p244_p11 = scmp.lt.s32.totalorder %s150_s1, %s150_s1 }
  0x1d   :  { %161 = vmatprep.subr.mxu0 %v70_v2  ;;  %v52_v7 = vld [vmem:[#allocation5 + $0x60] sm:$0xff]  ;;  %v51_v9 = vld [vmem:[#allocation5 + $0x58] sm:$0xff]  ;;  %v66_v10 = vld [vmem:[#allocation5 + $0xd0] sm:$0xff]  ;;  %p240_p10 = scmp.ne.s32.totalorder %s150_s1, %s239_s21  ;;  %p245_p12 = scmp.lt.s32.totalorder %s239_s21, %s239_s21 }
  0x1e   :  { %162 = vmatpush3.msra.mxu0 %v54_v3  ;;  %v50_v11 = vld [vmem:[#allocation5 + $0x50] sm:$0xff]  ;;  %v65_v12 = vld [vmem:[#allocation5 + $0xc8] sm:$0xff]  ;;  %v39_v13 = vld [vmem:[#allocation2 + $0x8] sm:$0xff] }
  0x1f   :  { %163 = vmatprep.subr.mxu0 %v69_v4  ;;  %v49_v14 = vld [vmem:[#allocation5 + $0x48] sm:$0xff]  ;;  %136 = vmatprep.mubr.f32.mxu0 %v39_v13  ;;  %v64_v15 = vld [vmem:[#allocation5 + $0xc0] sm:$0xff]  ;;  %v63_v17 = vld [vmem:[#allocation5 + $0xb8] sm:$0xff]  ;;  %p246_p13 = por %p245_p12, %p244_p11 }
  0x20   :  { %164 = vmatpush3.msra.mxu0 %v53_v5  ;;  %v48_v16 = vld [vmem:[#allocation5 + $0x40] sm:$0xff]  ;;  %v47_v18 = vld [vmem:[#allocation5 + $0x38] sm:$0xff]  ;;  %v62_v19 = vld [vmem:[#allocation5 + $0xb0] sm:$0xff] }
  0x21   :  { %165 = vmatprep.subr.mxu0 %v68_v6  ;;  %v46_v20 = vld [vmem:[#allocation5 + $0x30] sm:$0xff]  ;;  %v61_v21 = vld [vmem:[#allocation5 + $0xa8] sm:$0xff]  ;;  %v60_v23 = vld [vmem:[#allocation5 + $0xa0] sm:$0xff]  ;;  %p247_p0 = pnand %p246_p13, %p240_p10 }
  0x22   :  { %166 = vmatpush3.msra.mxu0 %v52_v7  ;;  %v45_v22 = vld [vmem:[#allocation5 + $0x28] sm:$0xff]  ;;  %v44_v24 = vld [vmem:[#allocation5 + $0x20] sm:$0xff]  ;;  %v59_v25 = vld [vmem:[#allocation5 + $0x98] sm:$0xff] }
  0x23   :  { %167 = vmatprep.subr.mxu0 %v67_v8  ;;  %v43_v26 = vld [vmem:[#allocation5 + $0x18] sm:$0xff]  ;;  %v58_v27 = vld [vmem:[#allocation5 + $0x90] sm:$0xff]  ;;  %v57_v29 = vld [vmem:[#allocation5 + $0x88] sm:$0xff] }
  0x24   :  { %168 = vmatpush3.msra.mxu0 %v51_v9  ;;  %v42_v28 = vld [vmem:[#allocation5 + $0x10] sm:$0xff]  ;;  %v41_v30 = vld [vmem:[#allocation5 + $0x8] sm:$0xff]  ;;  %v56_v31 = vld [vmem:[#allocation5 + $0x80] sm:$0xff] }
  0x25   :  { %169 = vmatprep.subr.mxu0 %v66_v10  ;;  %v40_v32 = vld [vmem:[#allocation5] sm:$0xff]  ;;  %v38_v33 = vld [vmem:[#allocation2] sm:$0xff] }
  0x26   :  { %170 = vmatpush3.msra.mxu0 %v50_v11 }
  0x27   :  { %171 = vmatprep.subr.mxu0 %v65_v12 }
  0x28   :  { %172 = vmatpush3.msra.mxu0 %v49_v14 }
  0x29   :  { %173 = vmatprep.subr.mxu0 %v64_v15 }
  0x2a   :  { %174 = vmatpush3.msra.mxu0 %v48_v16 }
  0x2b   :  { %175 = vmatprep.subr.mxu0 %v63_v17 }
  0x2c   :  { %176 = vmatpush3.msra.mxu0 %v47_v18 }
  0x2d   :  { %177 = vmatprep.subr.mxu0 %v62_v19 }
  0x2e   :  { %178 = vmatpush3.msra.mxu0 %v46_v20 }
  0x2f   :  { %179 = vmatprep.subr.mxu0 %v61_v21 }
  0x30   :  { %180 = vmatpush3.msra.mxu0 %v45_v22 }
  0x31   :  { %181 = vmatprep.subr.mxu0 %v60_v23 }
  0x32   :  { %182 = vmatpush3.msra.mxu0 %v44_v24 }
  0x33   :  { %183 = vmatprep.subr.mxu0 %v59_v25 }
  0x34   :  { %184 = vmatpush3.msra.mxu0 %v43_v26 }
  0x35   :  { %185 = vmatprep.subr.mxu0 %v58_v27 }
  0x36   :  { %186 = vmatpush3.msra.mxu0 %v42_v28 }
  0x37   :  { %187 = vmatprep.subr.mxu0 %v57_v29 }
  0x38   :  { %188 = vmatpush3.msra.mxu0 %v41_v30 }
  0x39   :  { %189 = vmatprep.subr.mxu0 %v56_v31 }
  0x3a   :  { %190 = vmatpush3.msra.mxu0 %v40_v32 }
  0x3b   :  { %137 = vmatmul.mubr.f32.vlgmr.msra.gmra.mxu0 %v38_v33 }
  0xfb   :  { %v191_v34 = vpop.f32.mrf.mxu0 }
  0xfd   :  { %v192_v35 = vpop.f32.mrf.mxu0 }
  0xfe   :  { %v193_v36 = vadd.f32 %v192_v35, %v191_v34 }
 0x100   :  { %142 = vst [vmem:[#allocation7] sm:$0xff] %v193_v36 }
 0x101   :  { %250 = shalt.err (!%p247_p0)
}
 0x102   :  { %152 = dma.vmem_to_hbm [thread:$0]  %s150_s1, 128, %s296_s2, [#allocation4]  }
 0x103   :  { %263 = dma.done.wait [#allocation4], 128  }
 0x104   :  { %264 = vsyncadd [#allocation4], 4294967168 }
 0x105   :  { %156 = vsyncpa [#allocation3], 1 }
 0x106   :  { %157 = vsyncpa [#allocation6], 1 }
 0x107   :  { %158 = vsyncpa [#allocation4], 1 }

</bundles_post_ra>
